<compile_context>
chip_gen: v7x
topology: tpu7x:2x2x1
jax: 0.10.0
libtpu: 0.0.40
codegen_flags: <defaults>
</compile_context>

<pallas_src>
import functools

import numpy as np
import jax
import jax.numpy as jnp
from jax.experimental import pallas as pl
from jax.experimental.pallas import tpu as pltpu


def _pos_emb_kernel(x_ref, se_ref, so_ref, o_ref):
    # x_ref:  (TILE_B, 2)  — columns 0 and 1 of the input (f32)
    # se_ref: (1, D)       — 10000**(-i/D) on even lanes, 0 on odd lanes
    # so_ref: (1, D)       — 10000**(-(i-1)/D) on odd lanes, 0 on even lanes
    # o_ref:  (TILE_B, D)
    x = x_ref[...]
    x0 = x[:, 0:1]                      # (TILE_B, 1)
    x1 = x[:, 1:2]                      # (TILE_B, 1)
    o_ref[...] = x0 * se_ref[...] + x1 * so_ref[...]


def _round_up(v: int, m: int) -> int:
    return ((v + m - 1) // m) * m


@functools.partial(jax.jit, static_argnames=("embedding_dim",))
def positional_embedder(x: jax.Array, embedding_dim: int) -> jax.Array:
    """x: (B, F) with F >= 2. Returns (B, embedding_dim) float32."""
    B = x.shape[0]
    D = embedding_dim

    # Trace-time numpy constants -> compile-time constants in the executable.
    i = np.arange(D)
    exponent = (i - (i % 2)) / float(D)
    scale = 10000.0 ** (-exponent)
    even = (i % 2) == 0
    scale_even = jnp.asarray(
        np.where(even, scale, 0.0).astype(np.float32).reshape(1, D))
    scale_odd = jnp.asarray(
        np.where(~even, scale, 0.0).astype(np.float32).reshape(1, D))

    # Only the first two feature columns are needed (fuses into this dispatch).
    x2 = x[:, :2].astype(jnp.float32)

    # Batch tiling: ~8 MiB output tile cap (16 MiB double-buffered, fits the
    # 32 MiB vmem limit on every generation), rows rounded to sublane multiple
    # of 8, and >= 2 grid steps whenever possible so the parallel batch axis
    # can shard across both v7x TensorCores.
    b_round8 = _round_up(B, 8)
    cap_rows = max(8, (((8 << 20) // (D * 4)) // 8) * 8)
    n_steps = pl.cdiv(b_round8, cap_rows)
    if b_round8 >= 16:
        n_steps = max(n_steps, 2)
    tile_b = _round_up(pl.cdiv(b_round8, n_steps), 8)
    grid = (pl.cdiv(B, tile_b),)        # ragged last block -> masked store

    cost = pl.CostEstimate(
        flops=3 * B * D,
        transcendentals=0,
        bytes_accessed=B * D * 4 + B * 2 * 4 + 2 * D * 4,
    )

    out = pl.pallas_call(
        _pos_emb_kernel,
        out_shape=jax.ShapeDtypeStruct((B, D), jnp.float32),
        grid=grid,
        in_specs=[
            pl.BlockSpec((tile_b, 2), lambda i: (i, 0)),
            pl.BlockSpec((1, D), lambda i: (0, 0)),   # VMEM-resident constant
            pl.BlockSpec((1, D), lambda i: (0, 0)),   # VMEM-resident constant
        ],
        out_specs=pl.BlockSpec((tile_b, D), lambda i: (i, 0)),
        compiler_params=pltpu.CompilerParams(
            dimension_semantics=("parallel",),
            vmem_limit_bytes=32 << 20,
        ),
        cost_estimate=cost,
    )(x2, scale_even, scale_odd)

    return out


def _reference(x: np.ndarray, embedding_dim: int) -> np.ndarray:
    B = x.shape[0]
    D = embedding_dim
    out = np.zeros((B, D), dtype=np.float32)
    for i in range(D):
        if i % 2 == 0:
            out[:, i] = x[:, 0] / np.power(10000, i / D)
        else:
            out[:, i] = x[:, 1] / np.power(10000, (i - 1) / D)
    return out


if __name__ == "__main__":
    key = jax.random.PRNGKey(0)
    B, F, D = 8, 2, 32
    x = jax.random.normal(key, (B, F), dtype=jnp.float32)

    out = positional_embedder(x, D)
    out = jax.block_until_ready(out)

    ref = _reference(np.asarray(x), D)
    np.testing.assert_allclose(np.asarray(out), ref, rtol=1e-5, atol=1e-5)

    # A second, larger shape: F > 2, D not a multiple of 128, B not a multiple
    # of the tile -> exercises multi-step grid + ragged (masked) last block.
    B2, F2, D2 = 300, 5, 96
    x2 = jax.random.normal(jax.random.PRNGKey(1), (B2, F2), dtype=jnp.float32)
    out2 = jax.block_until_ready(positional_embedder(x2, D2))
    ref2 = _reference(np.asarray(x2), D2)
    np.testing.assert_allclose(np.asarray(out2), ref2, rtol=1e-5, atol=1e-5)

    print("KERNEL_OK")
</pallas_src>

<mosaic_0001>
module attributes {stable_mosaic.version = 11 : i64} {
  func.func @_pos_emb_kernel(%arg0: i32, %arg1: memref<8x2xf32, #tpu.memory_space<vmem>>, %arg2: memref<1x32xf32, #tpu.memory_space<vmem>>, %arg3: memref<1x32xf32, #tpu.memory_space<vmem>>, %arg4: memref<8x32xf32, #tpu.memory_space<vmem>>) attributes {dimension_semantics = [#tpu.dimension_semantics<parallel>], iteration_bounds = array<i64: 1>, scalar_prefetch = 0 : i64, scratch_operands = 0 : i64, tpu.core_type = #tpu.core_type<tc>, window_params = [{transform_indices = @transform_0, window_bounds = array<i64: 8, 2>}, {pipeline_mode = #tpu.pipeline_mode<synchronous>, transform_indices = @transform_1, window_bounds = array<i64: 1, 32>}, {pipeline_mode = #tpu.pipeline_mode<synchronous>, transform_indices = @transform_2, window_bounds = array<i64: 1, 32>}, {transform_indices = @transform_3, window_bounds = array<i64: 8, 32>}]} {
    %c0 = arith.constant 0 : index
    %c0_0 = arith.constant 0 : index
    %0 = vector.load %arg1[%c0, %c0_0] : memref<8x2xf32, #tpu.memory_space<vmem>>, vector<8x2xf32>
    %1 = vector.extract_strided_slice %0 {offsets = [0, 0], sizes = [8, 1], strides = [1, 1]} : vector<8x2xf32> to vector<8x1xf32>
    %2 = vector.extract_strided_slice %0 {offsets = [0, 1], sizes = [8, 1], strides = [1, 1]} : vector<8x2xf32> to vector<8x1xf32>
    %c0_1 = arith.constant 0 : index
    %c0_2 = arith.constant 0 : index
    %3 = vector.load %arg2[%c0_1, %c0_2] : memref<1x32xf32, #tpu.memory_space<vmem>>, vector<1x32xf32>
    %4 = vector.broadcast %1 : vector<8x1xf32> to vector<8x32xf32>
    %5 = vector.broadcast %3 : vector<1x32xf32> to vector<8x32xf32>
    %6 = arith.mulf %4, %5 : vector<8x32xf32>
    %c0_3 = arith.constant 0 : index
    %c0_4 = arith.constant 0 : index
    %7 = vector.load %arg3[%c0_3, %c0_4] : memref<1x32xf32, #tpu.memory_space<vmem>>, vector<1x32xf32>
    %8 = vector.broadcast %2 : vector<8x1xf32> to vector<8x32xf32>
    %9 = vector.broadcast %7 : vector<1x32xf32> to vector<8x32xf32>
    %10 = arith.mulf %8, %9 : vector<8x32xf32>
    %11 = arith.addf %6, %10 : vector<8x32xf32>
    %c0_5 = arith.constant 0 : index
    %c0_6 = arith.constant 0 : index
    %12 = vector.load %arg4[%c0_5, %c0_6] : memref<8x32xf32, #tpu.memory_space<vmem>>, vector<8x32xf32>
    tpu.vector_store %arg4[%c0_5, %c0_6], %11 {strides = array<i32>} : memref<8x32xf32, #tpu.memory_space<vmem>>, vector<8x32xf32>,
    return
  }
  func.func @transform_0(%arg0: i32) -> (i32, i32) {
    %c0_i32 = arith.constant 0 : i32
    %c0_i32_0 = arith.constant 0 : i32
    return %arg0, %c0_i32 : i32, i32
  }
  func.func @transform_1(%arg0: i32) -> (i32, i32) {
    %c0_i32 = arith.constant 0 : i32
    %c0_i32_0 = arith.constant 0 : i32
    %c0_i32_1 = arith.constant 0 : i32
    return %c0_i32, %c0_i32_0 : i32, i32
  }
  func.func @transform_2(%arg0: i32) -> (i32, i32) {
    %c0_i32 = arith.constant 0 : i32
    %c0_i32_0 = arith.constant 0 : i32
    %c0_i32_1 = arith.constant 0 : i32
    return %c0_i32, %c0_i32_0 : i32, i32
  }
  func.func @transform_3(%arg0: i32) -> (i32, i32) {
    %c0_i32 = arith.constant 0 : i32
    %c0_i32_0 = arith.constant 0 : i32
    return %arg0, %c0_i32 : i32, i32
  }
}

</mosaic_0001>

<bundles_post_ra>
// kernel: positional_embedder.1
= control target key start
LH: loop header
LB: loop body
LE: loop exit
PB: predicated region body
PF: predicated region fallthrough
CT: control target
= control target key end

     0   :  { %v89_v1 = vmov 0   ;;  %s133_s0 = inlined_call_operand.vmem [shape: f32[8,2], index: 0, kind: input, shape index: {}]   ;;  %s134_s1 = inlined_call_operand.vmem [shape: f32[1,32], index: 1, kind: input, shape index: {}]   ;;  %s135_s2 = inlined_call_operand.vmem [shape: f32[1,32], index: 2, kind: input, shape index: {}]   ;;  %s136_s3 = inlined_call_operand.hbm [shape: f32[8,32], index: 3, kind: output, shape index: {}]  }
   0x1   :  { %v15_v0 = vld [vmem:[%s133_s0] sm:$0xff]  ;;  %63 = vset.pattern.permute.xlu0 %v89_v1 }
   0x2   :  { %8 = vsyncpa [#allocation3], 0  ;;  %19 = vperm.xlu0 %63, %v15_v0   ;;  %v90_v2 = vmov 1   ;;  %v58_v4 = vld [vmem:[%s134_s1] ss:$0 sm:$0xff]  ;;  %s91_s18 = smov [#allocation2]  }
   0x3   :  { %v59_v5 = vld [vmem:[%s135_s2] ss:$0 sm:$0xff]  ;;  %s50_s19 = sshll.u32 %s91_s18, 4  ;;  %vm42_vm0 = vcmask 261120   ;;  %s51_s19 = int_to_ptr.vmem [resolvable:$true] %s50_s19 }
   0x4   :  { %s65_s0 = scalar_lea.vmem %s51_s19, 128  ;;  %p70_p1 = scmp.lt.s32.totalorder %s51_s19, %s51_s19 }
   0x5   :  { %p66_p0 = scmp.ne.s32.totalorder %s51_s19, %s65_s0  ;;  %p71_p2 = scmp.lt.s32.totalorder %s65_s0, %s65_s0 }
   0x6   :  { %64 = vset.pattern.permute.xlu0 %v90_v2 }
   0x7   :  { %31 = vperm.xlu0 %64, %v15_v0   ;;  %p72_p3 = por %p71_p2, %p70_p1 }
   0x9   :  { %p73_p4 = pnand %p72_p3, %p66_p0 }
  0x81   :  { %v20_v3 = vpop.permute.xlu0 %19 }
  0x82   :  { %v28_v7 = vmul.f32 %v58_v4, %v20_v3 }
  0x86   :  { %v32_v6 = vpop.permute.xlu0 %31 }
  0x87   :  { %v40_v8 = vmul.f32 %v59_v5, %v32_v6 }
  0x89   :  { %v41_v9 = vadd.f32 %v40_v8, %v28_v7 }
  0x8b   :  { %43 = vst.msk [vmem:[#allocation2] sm:$0xff] %vm42_vm0, %v41_v9 }
  0x8c   :  { %76 = shalt.err (!%p73_p4)
}
  0x8d   :  { %s77_s2 = scalar_lea.hbm %s136_s3, 128 }
  0x8e   :  { %p78_p5 = scmp.ne.s32.totalorder %s136_s3, %s77_s2  ;;  %p81_p6 = scmp.lt.u32.totalorder %s77_s2, %s136_s3 }
  0x90   :  { %p83_p7 = pnand %p81_p6, %p78_p5 }
  0x92   :  { %86 = shalt.err (!%p83_p7)
}
  0x93   :  { %53 = dma.vmem_to_hbm [thread:$0]  %s51_s19, 128, %s136_s3, [#allocation3]  }
  0x94   :  { %87 = dma.done.wait [#allocation3], 128  }
  0x95   :  { %88 = vsyncadd [#allocation3], 4294967168 }
  0x96   :  { %57 = vsyncpa [#allocation3], 1 }

</bundles_post_ra>
